<compile_context>
chip_gen: v7x
topology: tpu7x:2x2x1
jax: 0.10.0
libtpu: 0.0.40
codegen_flags: <defaults>
</compile_context>

<pallas_src>
import jax
import jax.numpy as jnp
import numpy as np
from jax.experimental import pallas as pl
from jax.experimental.pallas import tpu as pltpu


def _reg_l1_kernel(ind_ref,    # VMEM (BB, 1, K)  int32
                   feat_ref,   # VMEM (BB, C, HW_BLK)  source dtype (pipelined slab)
                   mask_ref,   # VMEM (BB, 1, K)  f32
                   tgt_ref,    # VMEM (BB, C, K)  f32 (target transposed)
                   out_ref,    # VMEM (1, 1, 128) f32  lane0=num partial, lane1=den partial
                   pred_acc):  # VMEM (BB, C, K)  f32 scratch (gather accumulator)
    j = pl.program_id(1)
    n_hw = pl.num_programs(1)
    BB, C, hw_blk = feat_ref.shape
    K = tgt_ref.shape[-1]

    @pl.when(j == 0)
    def _():
        pred_acc[...] = jnp.zeros_like(pred_acc)

    # One-hot gather on the MXU: onehot[b,h,k] = (h + off == ind[b,k]).
    off = j * hw_blk
    hw_idx = jax.lax.broadcasted_iota(jnp.int32, (BB, hw_blk, K), 1) + off
    onehot = (hw_idx == ind_ref[...]).astype(feat_ref.dtype)          # (BB, hw_blk, K)
    pred_acc[...] += jnp.einsum("bch,bhk->bck", feat_ref[...], onehot,
                                preferred_element_type=jnp.float32)

    @pl.when(j == n_hw - 1)
    def _():
        m = mask_ref[...]                          # (BB, 1, K), broadcasts over C
        t = tgt_ref[...].astype(jnp.float32)       # (BB, C, K)
        # |pred*m - t*m| == |(pred - t) * m|  (single multiply per element).
        num = jnp.sum(jnp.abs((pred_acc[...] - t) * m))
        den = jnp.float32(C) * jnp.sum(m)          # mask expanded over C channels
        lane = jax.lax.broadcasted_iota(jnp.int32, out_ref.shape, 2)
        out_ref[...] = jnp.where(
            lane == 0, num, jnp.where(lane == 1, den, jnp.float32(0.0))
        ).astype(out_ref.dtype)


def _choose_batch_block(B):
    for bb in (8, 4, 2):
        if B % bb == 0:
            return bb
    return 1


def _choose_hw_block(HW, cap=1024):
    # Last block dim must be a multiple of 128 or the full extent, and must
    # divide HW so every grid step sees a real block.
    if HW % 128 != 0 or HW <= cap:
        return HW
    blk = cap
    while HW % blk != 0:
        blk -= 128
    return blk


@jax.jit
def reg_l1_loss(output, mask, ind, target):
    """output: (B, C, H, W), mask: (B, K), ind: (B, K) int, target: (B, K, C)."""
    B, C, H, W = output.shape
    K = ind.shape[1]
    HW = H * W

    BB = _choose_batch_block(B)
    HW_BLK = _choose_hw_block(HW)

    feat = output.reshape(B, C, HW)                                 # free reshape, keep dtype
    mask_f = mask.astype(jnp.float32).reshape(B, 1, K)              # K on lane axis
    tgt_t = jnp.transpose(target.astype(jnp.float32), (0, 2, 1))    # (B, C, K), tiny
    ind_i = ind.astype(jnp.int32).reshape(B, 1, K)

    parts = pl.pallas_call(
        _reg_l1_kernel,
        out_shape=jax.ShapeDtypeStruct((B // BB, 1, 128), jnp.float32),
        grid_spec=pltpu.PrefetchScalarGridSpec(
            num_scalar_prefetch=0,
            grid=(B // BB, HW // HW_BLK),
            in_specs=[
                pl.BlockSpec((BB, 1, K), lambda i, j: (i, 0, 0)),       # ind
                pl.BlockSpec((BB, C, HW_BLK), lambda i, j: (i, 0, j)),  # feat slab
                pl.BlockSpec((BB, 1, K), lambda i, j: (i, 0, 0)),       # mask
                pl.BlockSpec((BB, C, K), lambda i, j: (i, 0, 0)),       # target^T
            ],
            out_specs=pl.BlockSpec((1, 1, 128), lambda i, j: (i, 0, 0)),
            scratch_shapes=[pltpu.VMEM((BB, C, K), jnp.float32)],
        ),
        compiler_params=pltpu.CompilerParams(
            dimension_semantics=("parallel", "arbitrary")),  # batch blocks independent
    )(ind_i, feat, mask_f, tgt_t)

    numerator = jnp.sum(parts[:, 0, 0])
    denominator = jnp.sum(parts[:, 0, 1]) + jnp.float32(1e-4)
    return numerator / denominator


def _reference(output, mask, ind, target):
    # Pure-JAX reference mirroring the PyTorch module.
    B, C, H, W = output.shape
    feat = jnp.transpose(output, (0, 2, 3, 1)).reshape(B, H * W, C)
    pred = jnp.take_along_axis(feat, ind[:, :, None].astype(jnp.int32), axis=1)
    m = mask.astype(jnp.float32)[:, :, None] * jnp.ones_like(pred)
    loss = jnp.sum(jnp.abs(pred * m - target * m))
    return loss / (jnp.sum(m) + 0.0001)


if __name__ == "__main__":
    B, C, H, W, K = 2, 4, 16, 16, 8

    key = jax.random.PRNGKey(0)
    k1, k2, k3, k4 = jax.random.split(key, 4)

    output = jax.random.normal(k1, (B, C, H, W), dtype=jnp.float32)
    target = jax.random.normal(k2, (B, K, C), dtype=jnp.float32)
    ind = jax.random.randint(k3, (B, K), 0, H * W, dtype=jnp.int32)
    mask = (jax.random.uniform(k4, (B, K)) > 0.3).astype(jnp.float32)

    loss = reg_l1_loss(output, mask, ind, target)
    jax.block_until_ready(loss)

    ref = _reference(output, mask, ind, target)
    assert np.isclose(np.asarray(loss), np.asarray(ref), rtol=1e-5, atol=1e-5), (
        float(loss), float(ref))

    print("KERNEL_OK")
</pallas_src>

<mosaic_0001>
module attributes {stable_mosaic.version = 11 : i64} {
  func.func @_reg_l1_kernel(%arg0: i32, %arg1: i32, %arg2: memref<2x1x8xi32, #tpu.memory_space<vmem>>, %arg3: memref<2x4x256xf32, #tpu.memory_space<vmem>>, %arg4: memref<2x1x8xf32, #tpu.memory_space<vmem>>, %arg5: memref<2x4x8xf32, #tpu.memory_space<vmem>>, %arg6: memref<1x1x128xf32, #tpu.memory_space<vmem>>, %arg7: memref<2x4x8xf32, #tpu.memory_space<vmem>>) attributes {dimension_semantics = [#tpu.dimension_semantics<parallel>, #tpu.dimension_semantics<arbitrary>], iteration_bounds = array<i64: 1, 1>, scalar_prefetch = 0 : i64, scratch_operands = 1 : i64, tpu.core_type = #tpu.core_type<tc>, window_params = [{transform_indices = @transform_0, window_bounds = array<i64: 2, 1, 8>}, {transform_indices = @transform_1, window_bounds = array<i64: 2, 4, 256>}, {transform_indices = @transform_2, window_bounds = array<i64: 2, 1, 8>}, {transform_indices = @transform_3, window_bounds = array<i64: 2, 4, 8>}, {transform_indices = @transform_4, window_bounds = array<i64: 1, 1, 128>}]} {
    %c0_i32 = arith.constant 0 : i32
    %0 = arith.cmpi eq, %arg1, %c0_i32 : i32
    %1 = arith.extui %0 : i1 to i32
    %c0_i32_0 = arith.constant 0 : i32
    %2 = arith.cmpi ne, %1, %c0_i32_0 : i32
    scf.if %2 {
      %cst_14 = arith.constant 0.000000e+00 : f32
      %20 = vector.broadcast %cst_14 : f32 to vector<2x4x8xf32>
      %c0_15 = arith.constant 0 : index
      %c0_16 = arith.constant 0 : index
      %c0_17 = arith.constant 0 : index
      %21 = vector.load %arg7[%c0_15, %c0_16, %c0_17] : memref<2x4x8xf32, #tpu.memory_space<vmem>>, vector<2x4x8xf32>
      tpu.vector_store %arg7[%c0_15, %c0_16, %c0_17], %20 {strides = array<i32>} : memref<2x4x8xf32, #tpu.memory_space<vmem>>, vector<2x4x8xf32>,
    } else {
    }
    %c256_i32 = arith.constant 256 : i32
    %3 = arith.muli %arg1, %c256_i32 : i32
    %4 = tpu.iota {dimensions = array<i32: 1>} : vector<2x256x8xi32>
    %5 = vector.broadcast %3 : i32 to vector<2x256x8xi32>
    %6 = arith.addi %4, %5 : vector<2x256x8xi32>
    %c0 = arith.constant 0 : index
    %c0_1 = arith.constant 0 : index
    %c0_2 = arith.constant 0 : index
    %7 = vector.load %arg2[%c0, %c0_1, %c0_2] : memref<2x1x8xi32, #tpu.memory_space<vmem>>, vector<2x1x8xi32>
    %8 = vector.broadcast %7 : vector<2x1x8xi32> to vector<2x256x8xi32>
    %9 = arith.cmpi eq, %6, %8 : vector<2x256x8xi32>
    %10 = arith.extui %9 : vector<2x256x8xi1> to vector<2x256x8xi32>
    %11 = arith.sitofp %10 : vector<2x256x8xi32> to vector<2x256x8xf32>
    %c0_3 = arith.constant 0 : index
    %c0_4 = arith.constant 0 : index
    %c0_5 = arith.constant 0 : index
    %12 = vector.load %arg7[%c0_3, %c0_4, %c0_5] : memref<2x4x8xf32, #tpu.memory_space<vmem>>, vector<2x4x8xf32>
    %c0_6 = arith.constant 0 : index
    %c0_7 = arith.constant 0 : index
    %c0_8 = arith.constant 0 : index
    %13 = vector.load %arg3[%c0_6, %c0_7, %c0_8] : memref<2x4x256xf32, #tpu.memory_space<vmem>>, vector<2x4x256xf32>
    "tpu.trace_start"() <{level = 10 : i32, message = "bch,bhk->bck"}> : () -> ()
    %cst = arith.constant dense<0.000000e+00> : vector<2x4x8xf32>
    %14 = tpu.matmul %13, %11, %cst {dimension_numbers = #tpu.dot_dimension_numbers<[2], [1], [1], [2], [0, 0, 0, 1, 1, 2], [0], [0]>} : vector<2x4x256xf32>, vector<2x256x8xf32>, vector<2x4x8xf32> -> vector<2x4x8xf32>
    "tpu.trace_stop"() : () -> ()
    %15 = arith.addf %12, %14 : vector<2x4x8xf32>
    %c0_9 = arith.constant 0 : index
    %c0_10 = arith.constant 0 : index
    %c0_11 = arith.constant 0 : index
    %16 = vector.load %arg7[%c0_9, %c0_10, %c0_11] : memref<2x4x8xf32, #tpu.memory_space<vmem>>, vector<2x4x8xf32>
    tpu.vector_store %arg7[%c0_9, %c0_10, %c0_11], %15 {strides = array<i32>} : memref<2x4x8xf32, #tpu.memory_space<vmem>>, vector<2x4x8xf32>,
    %c0_i32_12 = arith.constant 0 : i32
    %17 = arith.cmpi eq, %arg1, %c0_i32_12 : i32
    %18 = arith.extui %17 : i1 to i32
    %c0_i32_13 = arith.constant 0 : i32
    %19 = arith.cmpi ne, %18, %c0_i32_13 : i32
    scf.if %19 {
      %c0_14 = arith.constant 0 : index
      %c0_15 = arith.constant 0 : index
      %c0_16 = arith.constant 0 : index
      %20 = vector.load %arg4[%c0_14, %c0_15, %c0_16] : memref<2x1x8xf32, #tpu.memory_space<vmem>>, vector<2x1x8xf32>
      %c0_17 = arith.constant 0 : index
      %c0_18 = arith.constant 0 : index
      %c0_19 = arith.constant 0 : index
      %21 = vector.load %arg5[%c0_17, %c0_18, %c0_19] : memref<2x4x8xf32, #tpu.memory_space<vmem>>, vector<2x4x8xf32>
      %c0_20 = arith.constant 0 : index
      %c0_21 = arith.constant 0 : index
      %c0_22 = arith.constant 0 : index
      %22 = vector.load %arg7[%c0_20, %c0_21, %c0_22] : memref<2x4x8xf32, #tpu.memory_space<vmem>>, vector<2x4x8xf32>
      %23 = arith.subf %22, %21 : vector<2x4x8xf32>
      %24 = vector.broadcast %20 : vector<2x1x8xf32> to vector<2x4x8xf32>
      %25 = arith.mulf %23, %24 : vector<2x4x8xf32>
      %26 = math.absf %25 : vector<2x4x8xf32>
      %27 = vector.shape_cast %26 : vector<2x4x8xf32> to vector<1x2x4x8xf32>
      %cst_23 = arith.constant dense<0.000000e+00> : vector<1xf32>
      %28 = vector.multi_reduction <add>, %27, %cst_23 [1, 2, 3] : vector<1x2x4x8xf32> to vector<1xf32>
      %29 = vector.shape_cast %28 : vector<1xf32> to vector<1x1x1x1xf32>
      %30 = vector.extract %29[0, 0, 0, 0] : f32 from vector<1x1x1x1xf32>
      %31 = vector.shape_cast %20 : vector<2x1x8xf32> to vector<1x2x1x8xf32>
      %cst_24 = arith.constant dense<0.000000e+00> : vector<1xf32>
      %32 = vector.multi_reduction <add>, %31, %cst_24 [1, 2, 3] : vector<1x2x1x8xf32> to vector<1xf32>
      %33 = vector.shape_cast %32 : vector<1xf32> to vector<1x1x1x1xf32>
      %34 = vector.extract %33[0, 0, 0, 0] : f32 from vector<1x1x1x1xf32>
      %cst_25 = arith.constant 4.000000e+00 : f32
      %35 = arith.mulf %cst_25, %34 : f32
      %36 = tpu.iota {dimensions = array<i32: 2>} : vector<1x1x128xi32>
      %c0_i32_26 = arith.constant 0 : i32
      %37 = vector.broadcast %c0_i32_26 : i32 to vector<1x1x128xi32>
      %38 = arith.cmpi eq, %36, %37 : vector<1x1x128xi32>
      %c1_i32 = arith.constant 1 : i32
      %39 = vector.broadcast %c1_i32 : i32 to vector<1x1x128xi32>
      %40 = arith.cmpi eq, %36, %39 : vector<1x1x128xi32>
      %cst_27 = arith.constant 0.000000e+00 : f32
      %41 = vector.broadcast %35 : f32 to vector<1x1x128xf32>
      %42 = vector.broadcast %cst_27 : f32 to vector<1x1x128xf32>
      %43 = arith.select %40, %41, %42 : vector<1x1x128xi1>, vector<1x1x128xf32>
      %44 = vector.broadcast %30 : f32 to vector<1x1x128xf32>
      %45 = arith.select %38, %44, %43 : vector<1x1x128xi1>, vector<1x1x128xf32>
      %c0_28 = arith.constant 0 : index
      %c0_29 = arith.constant 0 : index
      %c0_30 = arith.constant 0 : index
      %46 = vector.load %arg6[%c0_28, %c0_29, %c0_30] : memref<1x1x128xf32, #tpu.memory_space<vmem>>, vector<1x1x128xf32>
      tpu.vector_store %arg6[%c0_28, %c0_29, %c0_30], %45 {strides = array<i32>} : memref<1x1x128xf32, #tpu.memory_space<vmem>>, vector<1x1x128xf32>,
    } else {
    }
    return
  }
  func.func @transform_0(%arg0: i32, %arg1: i32) -> (i32, i32, i32) {
    %c0_i32 = arith.constant 0 : i32
    %c0_i32_0 = arith.constant 0 : i32
    %c0_i32_1 = arith.constant 0 : i32
    return %arg0, %c0_i32, %c0_i32_0 : i32, i32, i32
  }
  func.func @transform_1(%arg0: i32, %arg1: i32) -> (i32, i32, i32) {
    %c0_i32 = arith.constant 0 : i32
    %c0_i32_0 = arith.constant 0 : i32
    return %arg0, %c0_i32, %arg1 : i32, i32, i32
  }
  func.func @transform_2(%arg0: i32, %arg1: i32) -> (i32, i32, i32) {
    %c0_i32 = arith.constant 0 : i32
    %c0_i32_0 = arith.constant 0 : i32
    %c0_i32_1 = arith.constant 0 : i32
    return %arg0, %c0_i32, %c0_i32_0 : i32, i32, i32
  }
  func.func @transform_3(%arg0: i32, %arg1: i32) -> (i32, i32, i32) {
    %c0_i32 = arith.constant 0 : i32
    %c0_i32_0 = arith.constant 0 : i32
    %c0_i32_1 = arith.constant 0 : i32
    return %arg0, %c0_i32, %c0_i32_0 : i32, i32, i32
  }
  func.func @transform_4(%arg0: i32, %arg1: i32) -> (i32, i32, i32) {
    %c0_i32 = arith.constant 0 : i32
    %c0_i32_0 = arith.constant 0 : i32
    %c0_i32_1 = arith.constant 0 : i32
    return %arg0, %c0_i32, %c0_i32_0 : i32, i32, i32
  }
}

</mosaic_0001>

<bundles_post_ra>
// kernel: reg_l1_loss.1
= control target key start
LH: loop header
LB: loop body
LE: loop exit
PB: predicated region body
PF: predicated region fallthrough
CT: control target
= control target key end

     0   :  { %v25_v0 = vlaneseq  ;;  %v786_v14 = vmov 1.0|1.0   ;;  %v787_v40 = vmov 0.0   ;;  %s1024_s0 = inlined_call_operand.vmem [shape: s32[2,1,8], index: 0, kind: input, shape index: {}]   ;;  %s1025_s1 = inlined_call_operand.vmem [shape: f32[2,4,256], index: 1, kind: input, shape index: {}]   ;;  %s1026_s2 = inlined_call_operand.vmem [shape: f32[2,1,8], index: 2, kind: input, shape index: {}]   ;;  %s1027_s3 = inlined_call_operand.vmem [shape: f32[2,4,8], index: 3, kind: input, shape index: {}]   ;;  %s1028_s4 = inlined_call_operand.vmem [shape: f32[1,1,128], index: 4, kind: output, shape index: {}]  }
   0x1   :  { %v816_v1 = vld [vmem:[%s1025_s1] sm:$0xff]  ;;  %v831_v5 = vld [vmem:[%s1025_s1 + $0x8] sm:$0xff] }
   0x2   :  { %v819_v2 = vshrl.u32 %v25_v0, 7  ;;  %v824_v3 = vld [vmem:[%s1024_s0] ss:$0 sm:$0xff]  ;;  %v298_v4 = vcombine.high %v816_v1, %v816_v1  ;;  %v836_v6 = vld [vmem:[%s1024_s0 + $0x1] ss:$0 sm:$0xff]  ;;  %v371_v7 = vcombine.high %v831_v5, %v831_v5 }
   0x3   :  { %v451_v52 = vld [vmem:[%s1026_s2] sm:$0x1]  ;;  %v452_v53 = vld [vmem:[%s1026_s2 + $0x1] sm:$0x1]  ;;  %v454_v55 = vld [vmem:[%s1027_s3 + $0x4] sm:$0xf] }
   0x4   :  { %v42_v8 = vadd.s32 128, %v819_v2  ;;  %v43_v9 = vadd.s32 136, %v819_v2  ;;  %v27_v10 = vadd.s32 8, %v819_v2  ;;  %364 = vmatprep.mubr.f32.mxu0 %v298_v4  ;;  %vm101_vm0 = vcmp.eq.s32.totalorder %v819_v2, %v824_v3  ;;  %437 = vmatprep.mubr.f32.mxu1 %v371_v7  ;;  %v453_v54 = vld [vmem:[%s1027_s3] sm:$0xf] }
   0x5   :  { %v44_v11 = vadd.s32 144, %v819_v2  ;;  %v45_v12 = vadd.s32 152, %v819_v2  ;;  %v28_v13 = vadd.s32 16, %v819_v2  ;;  %vm133_vm7 = vcmp.eq.s32.totalorder %v819_v2, %v836_v6 }
   0x6   :  { %vm117_vm1 = vcmp.eq.s32.totalorder %v42_v8, %v824_v3  ;;  %vm118_vm2 = vcmp.eq.s32.totalorder %v43_v9, %v824_v3  ;;  %vm149_vm3 = vcmp.eq.s32.totalorder %v42_v8, %v836_v6  ;;  %vm150_vm4 = vcmp.eq.s32.totalorder %v43_v9, %v836_v6 }
   0x7   :  { %vm714_vm5 = vmpackc.low %vm118_vm2, %vm117_vm1  ;;  %vm102_vm6 = vcmp.eq.s32.totalorder %v27_v10, %v824_v3  ;;  %vm134_vm8 = vcmp.eq.s32.totalorder %v27_v10, %v836_v6  ;;  %vm119_vm10 = vcmp.eq.s32.totalorder %v44_v11, %v824_v3  ;;  %vm120_vm11 = vcmp.eq.s32.totalorder %v45_v12, %v824_v3 }
   0x8   :  { %715 = vmatprep.subr.msk.bf16.mxu0 %vm714_vm5, %v786_v14  ;;  %vm746_vm9 = vmpackc.low %vm150_vm4, %vm149_vm3  ;;  %v29_v15 = vadd.s32 24, %v819_v2  ;;  %vm151_vm13 = vcmp.eq.s32.totalorder %v44_v11, %v836_v6  ;;  %vm152_vm14 = vcmp.eq.s32.totalorder %v45_v12, %v836_v6  ;;  %v46_v16 = vadd.s32 160, %v819_v2 }
   0x9   :  { %747 = vmatprep.subr.msk.bf16.mxu1 %vm746_vm9, %v786_v14  ;;  %vm716_vm12 = vmpackc.low %vm102_vm6, %vm101_vm0  ;;  %v47_v17 = vadd.s32 168, %v819_v2  ;;  %vm103_vm1 = vcmp.eq.s32.totalorder %v28_v13, %v824_v3  ;;  %v30_v18 = vadd.s32 32, %v819_v2  ;;  %v31_v19 = vadd.s32 40, %v819_v2 }
   0xa   :  { %717 = vmatpush3.bf16.msk.msra.mxu0 %vm716_vm12, %v786_v14  ;;  %vm748_vm15 = vmpackc.low %vm134_vm8, %vm133_vm7  ;;  %vm104_vm2 = vcmp.eq.s32.totalorder %v29_v15, %v824_v3  ;;  %vm135_vm3 = vcmp.eq.s32.totalorder %v28_v13, %v836_v6  ;;  %vm136_vm4 = vcmp.eq.s32.totalorder %v29_v15, %v836_v6  ;;  %vm121_vm6 = vcmp.eq.s32.totalorder %v46_v16, %v824_v3 }
   0xb   :  { %749 = vmatpush3.bf16.msk.msra.mxu1 %vm748_vm15, %v786_v14  ;;  %vm718_vm0 = vmpackc.low %vm120_vm11, %vm119_vm10  ;;  %vm122_vm7 = vcmp.eq.s32.totalorder %v47_v17, %v824_v3  ;;  %v48_v20 = vadd.s32 176, %v819_v2  ;;  %vm153_vm9 = vcmp.eq.s32.totalorder %v46_v16, %v836_v6  ;;  %vm154_vm10 = vcmp.eq.s32.totalorder %v47_v17, %v836_v6 }
   0xc   :  { %719 = vmatprep.subr.msk.bf16.mxu0 %vm718_vm0, %v786_v14  ;;  %vm750_vm5 = vmpackc.low %vm152_vm14, %vm151_vm13  ;;  %v49_v21 = vadd.s32 184, %v819_v2  ;;  %vm105_vm12 = vcmp.eq.s32.totalorder %v30_v18, %v824_v3  ;;  %vm106_vm13 = vcmp.eq.s32.totalorder %v31_v19, %v824_v3  ;;  %v32_v22 = vadd.s32 48, %v819_v2 }
   0xd   :  { %751 = vmatprep.subr.msk.bf16.mxu1 %vm750_vm5, %v786_v14  ;;  %vm720_vm8 = vmpackc.low %vm104_vm2, %vm103_vm1  ;;  %v33_v23 = vadd.s32 56, %v819_v2  ;;  %vm137_vm15 = vcmp.eq.s32.totalorder %v30_v18, %v836_v6  ;;  %vm138_vm1 = vcmp.eq.s32.totalorder %v31_v19, %v836_v6  ;;  %vm123_vm0 = vcmp.eq.s32.totalorder %v48_v20, %v824_v3 }
   0xe   :  { %721 = vmatpush3.bf16.msk.msra.mxu0 %vm720_vm8, %v786_v14  ;;  %vm752_vm11 = vmpackc.low %vm136_vm4, %vm135_vm3  ;;  %vm124_vm3 = vcmp.eq.s32.totalorder %v49_v21, %v824_v3  ;;  %v50_v24 = vadd.s32 192, %v819_v2  ;;  %v51_v25 = vadd.s32 200, %v819_v2  ;;  %vm155_vm5 = vcmp.eq.s32.totalorder %v48_v20, %v836_v6 }
   0xf   :  { %753 = vmatpush3.bf16.msk.msra.mxu1 %vm752_vm11, %v786_v14  ;;  %vm722_vm14 = vmpackc.low %vm122_vm7, %vm121_vm6  ;;  %vm156_vm6 = vcmp.eq.s32.totalorder %v49_v21, %v836_v6  ;;  %vm107_vm8 = vcmp.eq.s32.totalorder %v32_v22, %v824_v3  ;;  %v34_v26 = vadd.s32 64, %v819_v2  ;;  %v35_v27 = vadd.s32 72, %v819_v2 }
  0x10   :  { %723 = vmatprep.subr.msk.bf16.mxu0 %vm722_vm14, %v786_v14  ;;  %vm754_vm2 = vmpackc.low %vm154_vm10, %vm153_vm9  ;;  %vm108_vm9 = vcmp.eq.s32.totalorder %v33_v23, %v824_v3  ;;  %vm139_vm11 = vcmp.eq.s32.totalorder %v32_v22, %v836_v6  ;;  %vm125_vm14 = vcmp.eq.s32.totalorder %v50_v24, %v824_v3  ;;  %v52_v28 = vadd.s32 208, %v819_v2 }
  0x11   :  { %755 = vmatprep.subr.msk.bf16.mxu1 %vm754_vm2, %v786_v14  ;;  %vm724_vm4 = vmpackc.low %vm106_vm13, %vm105_vm12  ;;  %vm140_vm12 = vcmp.eq.s32.totalorder %v33_v23, %v836_v6  ;;  %v53_v29 = vadd.s32 216, %v819_v2  ;;  %vm157_vm2 = vcmp.eq.s32.totalorder %v50_v24, %v836_v6  ;;  %v36_v30 = vadd.s32 80, %v819_v2 }
  0x12   :  { %725 = vmatpush3.bf16.msk.msra.mxu0 %vm724_vm4, %v786_v14  ;;  %vm756_vm7 = vmpackc.low %vm138_vm1, %vm137_vm15  ;;  %vm126_vm15 = vcmp.eq.s32.totalorder %v51_v25, %v824_v3  ;;  %vm109_vm4 = vcmp.eq.s32.totalorder %v34_v26, %v824_v3  ;;  %v37_v31 = vadd.s32 88, %v819_v2  ;;  %v54_v32 = vadd.s32 224, %v819_v2 }
  0x13   :  { %757 = vmatpush3.bf16.msk.msra.mxu1 %vm756_vm7, %v786_v14  ;;  %vm726_vm10 = vmpackc.low %vm124_vm3, %vm123_vm0  ;;  %vm158_vm0 = vcmp.eq.s32.totalorder %v51_v25, %v836_v6  ;;  %vm141_vm7 = vcmp.eq.s32.totalorder %v34_v26, %v836_v6  ;;  %v55_v33 = vadd.s32 232, %v819_v2  ;;  %v38_v34 = vadd.s32 96, %v819_v2 }
  0x14   :  { %727 = vmatprep.subr.msk.bf16.mxu0 %vm726_vm10, %v786_v14  ;;  %vm758_vm13 = vmpackc.low %vm156_vm6, %vm155_vm5  ;;  %vm110_vm5 = vcmp.eq.s32.totalorder %v35_v27, %v824_v3  ;;  %vm127_vm10 = vcmp.eq.s32.totalorder %v52_v28, %v824_v3  ;;  %v39_v35 = vadd.s32 104, %v819_v2  ;;  %v56_v36 = vadd.s32 240, %v819_v2 }
  0x15   :  { %759 = vmatprep.subr.msk.bf16.mxu1 %vm758_vm13, %v786_v14  ;;  %vm728_vm1 = vmpackc.low %vm108_vm9, %vm107_vm8  ;;  %vm142_vm8 = vcmp.eq.s32.totalorder %v35_v27, %v836_v6  ;;  %vm159_vm13 = vcmp.eq.s32.totalorder %v52_v28, %v836_v6  ;;  %v57_v37 = vadd.s32 248, %v819_v2  ;;  %v40_v38 = vadd.s32 112, %v819_v2 }
  0x16   :  { %729 = vmatpush3.bf16.msk.msra.mxu0 %vm728_vm1, %v786_v14  ;;  %vm760_vm3 = vmpackc.low %vm140_vm12, %vm139_vm11  ;;  %vm128_vm11 = vcmp.eq.s32.totalorder %v53_v29, %v824_v3  ;;  %vm111_vm1 = vcmp.eq.s32.totalorder %v36_v30, %v824_v3  ;;  %v41_v39 = vadd.s32 120, %v819_v2  ;;  %v463_v51 = vsub.s32 0, %v819_v2 }
  0x17   :  { %761 = vmatpush3.bf16.msk.msra.mxu1 %vm760_vm3, %v786_v14  ;;  %vm730_vm6 = vmpackc.low %vm126_vm15, %vm125_vm14  ;;  %vm160_vm14 = vcmp.eq.s32.totalorder %v53_v29, %v836_v6  ;;  %vm143_vm3 = vcmp.eq.s32.totalorder %v36_v30, %v836_v6  ;;  %v502_v23 = vand.u32 127, %v25_v0 }
  0x18   :  { %731 = vmatprep.subr.msk.bf16.mxu0 %vm730_vm6, %v786_v14  ;;  %vm762_vm9 = vmpackc.low %vm158_vm0, %vm157_vm2  ;;  %vm112_vm2 = vcmp.eq.s32.totalorder %v37_v31, %v824_v3  ;;  %vm129_vm6 = vcmp.eq.s32.totalorder %v54_v32, %v824_v3  ;;  %v464_v56 = vrot.slane %v451_v52, %v463_v51  ;;  %v468_v58 = vrot.slane %v452_v53, %v463_v51 }
  0x19   :  { %763 = vmatprep.subr.msk.bf16.mxu1 %vm762_vm9, %v786_v14  ;;  %vm732_vm12 = vmpackc.low %vm110_vm5, %vm109_vm4  ;;  %vm144_vm4 = vcmp.eq.s32.totalorder %v37_v31, %v836_v6  ;;  %vm161_vm9 = vcmp.eq.s32.totalorder %v54_v32, %v836_v6 }
  0x1a   :  { %733 = vmatpush3.bf16.msk.msra.mxu0 %vm732_vm12, %v786_v14  ;;  %vm764_vm15 = vmpackc.low %vm142_vm8, %vm141_vm7  ;;  %vm130_vm7 = vcmp.eq.s32.totalorder %v55_v33, %v824_v3  ;;  %vm113_vm12 = vcmp.eq.s32.totalorder %v38_v34, %v824_v3 }
  0x1b   :  { %765 = vmatpush3.bf16.msk.msra.mxu1 %vm764_vm15, %v786_v14  ;;  %vm734_vm0 = vmpackc.low %vm128_vm11, %vm127_vm10  ;;  %vm162_vm10 = vcmp.eq.s32.totalorder %v55_v33, %v836_v6  ;;  %vm145_vm15 = vcmp.eq.s32.totalorder %v38_v34, %v836_v6 }
  0x1c   :  { %735 = vmatprep.subr.msk.bf16.mxu0 %vm734_vm0, %v786_v14  ;;  %vm766_vm5 = vmpackc.low %vm160_vm14, %vm159_vm13  ;;  %vm114_vm13 = vcmp.eq.s32.totalorder %v39_v35, %v824_v3  ;;  %vm131_vm0 = vcmp.eq.s32.totalorder %v56_v36, %v824_v3 }
  0x1d   :  { %767 = vmatprep.subr.msk.bf16.mxu1 %vm766_vm5, %v786_v14  ;;  %vm736_vm8 = vmpackc.low %vm112_vm2, %vm111_vm1  ;;  %vm146_vm1 = vcmp.eq.s32.totalorder %v39_v35, %v836_v6  ;;  %vm163_vm5 = vcmp.eq.s32.totalorder %v56_v36, %v836_v6 }
  0x1e   :  { %737 = vmatpush3.bf16.msk.msra.mxu0 %vm736_vm8, %v786_v14  ;;  %vm768_vm11 = vmpackc.low %vm144_vm4, %vm143_vm3  ;;  %vm132_vm3 = vcmp.eq.s32.totalorder %v57_v37, %v824_v3  ;;  %vm164_vm8 = vcmp.eq.s32.totalorder %v57_v37, %v836_v6 }
  0x1f   :  { %769 = vmatpush3.bf16.msk.msra.mxu1 %vm768_vm11, %v786_v14  ;;  %vm738_vm14 = vmpackc.low %vm130_vm7, %vm129_vm6  ;;  %vm115_vm7 = vcmp.eq.s32.totalorder %v40_v38, %v824_v3  ;;  %vm116_vm11 = vcmp.eq.s32.totalorder %v41_v39, %v824_v3 }
  0x20   :  { %739 = vmatprep.subr.msk.bf16.mxu0 %vm738_vm14, %v786_v14  ;;  %vm770_vm2 = vmpackc.low %vm162_vm10, %vm161_vm9  ;;  %vm147_vm10 = vcmp.eq.s32.totalorder %v40_v38, %v836_v6  ;;  %vm148_vm14 = vcmp.eq.s32.totalorder %v41_v39, %v836_v6 }
  0x21   :  { %771 = vmatprep.subr.msk.bf16.mxu1 %vm770_vm2, %v786_v14  ;;  %vm740_vm4 = vmpackc.low %vm114_vm13, %vm113_vm12  ;;  %vm487_vm2 = vcmask 57344  }
  0x22   :  { %741 = vmatpush3.bf16.msk.msra.mxu0 %vm740_vm4, %v786_v14  ;;  %vm772_vm6 = vmpackc.low %vm146_vm1, %vm145_vm15  ;;  %vm21_vm1 = vcmask 60416   ;;  %v489_v6 = vsel %vm487_vm2, %v452_v53, 0.0 }
  0x23   :  { %773 = vmatpush3.bf16.msk.msra.mxu1 %vm772_vm6, %v786_v14  ;;  %vm742_vm9 = vmpackc.low %vm132_vm3, %vm131_vm0  ;;  %22 = vst.msk [vmem:[#allocation2] sm:$0xf] %vm21_vm1, %v787_v40  ;;  %vm504_vm0 = vcmp.eq.s32.totalorder %v502_v23, 1  ;;  %vm503_vm3 = vcmp.eq.s32.totalorder %v502_v23, 0 }
  0x24   :  { %743 = vmatprep.subr.msk.bf16.mxu0 %vm742_vm9, %v786_v14  ;;  %vm774_vm12 = vmpackc.low %vm164_vm8, %vm163_vm5  ;;  %23 = vst.msk [vmem:[#allocation2 + $0x4] sm:$0xf] %vm21_vm1, %v787_v40 }
  0x25   :  { %775 = vmatprep.subr.msk.bf16.mxu1 %vm774_vm12, %v786_v14  ;;  %vm744_vm13 = vmpackc.low %vm116_vm11, %vm115_vm7 }
  0x26   :  { %745 = vmatpush3.bf16.msk.msra.mxu0 %vm744_vm13, %v786_v14  ;;  %vm776_vm15 = vmpackc.low %vm148_vm14, %vm147_vm10 }
  0x27   :  { %777 = vmatpush3.bf16.msk.msra.mxu1 %vm776_vm15, %v786_v14 }
  0x29   :  { %365 = vmatmul.mubr.f32.vlgmr.msra.gmra.mrb[0].mxu0 %v816_v1 }
  0x2a   :  { %438 = vmatmul.mubr.f32.vlgmr.msra.gmra.mrb[0].mxu1 %v831_v5  ;;  %v293_v43 = vld [vmem:[#allocation2] sm:$0xf]  ;;  %v488_v5 = vsel %vm487_vm2, %v451_v52, 0.0 }
  0x2b   :  { %v294_v46 = vld [vmem:[#allocation2 + $0x4] sm:$0xf]  ;;  %v490_v8 = vadd.f32 %v489_v6, %v488_v5 }
  0xfc   :  { %v676_v41 = vpop.f32.mrb[0].mxu0 }
  0xfd   :  { %v711_v42 = vpop.f32.mrb[0].mxu1  ;;  %v677_v44 = vpop.f32.mrb[1].mxu0 }
  0xfe   :  { %v678_v45 = vadd.f32 %v677_v44, %v676_v41  ;;  %v712_v47 = vpop.f32.mrb[1].mxu1 }
  0xff   :  { %v713_v48 = vadd.f32 %v712_v47, %v711_v42 }
 0x100   :  { %v443_v49 = vadd.f32 %v678_v45, %v293_v43 }
 0x101   :  { %v444_v50 = vadd.f32 %v713_v48, %v294_v46 }
 0x102   :  { %446 = vst.msk [vmem:[#allocation2] sm:$0xf] %vm21_vm1, %v443_v49 }
 0x103   :  { %447 = vst.msk [vmem:[#allocation2 + $0x4] sm:$0xf] %vm21_vm1, %v444_v50 }
 0x109   :  { %v455_v57 = vld [vmem:[#allocation2] sm:$0xf] }
 0x10a   :  { %v456_v59 = vld [vmem:[#allocation2 + $0x4] sm:$0xf]  ;;  %v457_v60 = vsub.f32 %v455_v57, %v453_v54 }
 0x10b   :  { %v458_v61 = vsub.f32 %v456_v59, %v454_v55 }
 0x10c   :  { %v471_v62 = vmul.f32 %v464_v56, %v457_v60 }
 0x10d   :  { %v472_v63 = vmul.f32 %v468_v58, %v458_v61 }
 0x10e   :  { %v473_v1 = vand.u32 2147483647, %v471_v62 }
 0x10f   :  { %v474_v2 = vand.u32 2147483647, %v472_v63 }
 0x110   :  { %v475_v3 = vsel %vm21_vm1, %v473_v1, 0.0 }
 0x111   :  { %v476_v4 = vsel %vm21_vm1, %v474_v2, 0.0 }
 0x112   :  { %v477_v7 = vadd.f32 %v476_v4, %v475_v3 }
 0x114   :  { %478 = vadd.xlane.f32.xlu0 %v477_v7 }
 0x118   :  { %491 = vadd.xlane.f32.xlu0 %v490_v8 }
 0x1a1   :  { %v479_v9 = vpop.xlane.xlu0 %478 }
 0x1a2   :  { %v480_v10 = vrot.slane %v479_v9, 4 }
 0x1a4   :  { %v481_v11 = vadd.f32 %v480_v10, %v479_v9 }
 0x1a5   :  { %v492_v12 = vpop.xlane.xlu0 %491 }
 0x1a6   :  { %v482_v13 = vrot.slane %v481_v11, 2  ;;  %v493_v14 = vrot.slane %v492_v12, 4 }
 0x1a8   :  { %v494_v15 = vadd.f32 %v493_v14, %v492_v12  ;;  %v483_v16 = vadd.f32 %v482_v13, %v481_v11 }
 0x1aa   :  { %v495_v17 = vrot.slane %v494_v15, 2  ;;  %v484_v18 = vrot.slane %v483_v16, 1 }
 0x1ac   :  { %v496_v19 = vadd.f32 %v495_v17, %v494_v15  ;;  %v485_v20 = vadd.f32 %v484_v18, %v483_v16 }
 0x1ae   :  { %778 = vpush %v485_v20  ;;  %v497_v21 = vrot.slane %v496_v19, 1 }
 0x1b0   :  { %v498_v22 = vadd.f32 %v497_v21, %v496_v19 }
 0x1b2   :  { %780 = vpush %v498_v22 }
 0x1df   :  { %s779_s2 = spop %778 }
 0x1e0   :  { %v507_v25 = vstv %s779_s2 }
 0x1e3   :  { %s781_s3 = spop %780 }
 0x1e4   :  { %s500_s29 = smul.f32 4.0, %s781_s3 }
 0x1e6   :  { %v505_v24 = vstv %s500_s29 }
 0x1e7   :  { %v506_v26 = vsel %vm504_vm0, %v505_v24, 0.0 }
 0x1e8   :  { %v508_v27 = vsel %vm503_vm3, %v507_v25, %v506_v26 }
 0x1e9   :  { %509 = vst [vmem:[%s1028_s4] sm:$0x1] %v508_v27 }

</bundles_post_ra>
